<compile_context>
chip_gen: v7x
topology: tpu7x:2x2x1
jax: 0.10.0
libtpu: 0.0.40
codegen_flags: <defaults>
</compile_context>

<pallas_src>
import functools

import jax
import jax.numpy as jnp
from jax import lax
from jax.experimental import pallas as pl
from jax.experimental.pallas import tpu as pltpu


def _cmi_kernel(x_ref, cb_ref, wpw2_ref, w1b_ref, lnx_ref, lnc_ref,
                o_ref, buf_ref, *, eps):
    x3 = x_ref[0]                                   # [N, S, C_in]
    N, S, C_in = x3.shape
    C_out = cb_ref.shape[-1]
    C_cat = C_in + C_out
    NS = N * S

    cond = cb_ref[0, 0:1, :]                        # [1, C_out] = x_t @ w_ct + b_ct
    rbias = cb_ref[0, 1:2, :]                       # [1, C_out] = cond @ w_p_c + b_p + b2

    # LayerNorm((S, C_cat)) statistics per group n over the *virtual* concat,
    # using row-wise partial sums (lane reduce on VPU, then one sublane reduce).
    inv_n = 1.0 / float(S * C_cat)
    sum_c = jnp.sum(cond)                                            # scalar
    row_sum = jnp.sum(x3, axis=2, keepdims=True)                     # [N, S, 1]
    mean = (jnp.sum(row_sum, axis=1, keepdims=True)
            + float(S) * sum_c) * inv_n                              # [N, 1, 1]
    dx = x3 - mean                                                   # [N, S, C_in]
    dc = cond - mean                                                 # [N, 1, C_out]
    row_sq = jnp.sum(dx * dx, axis=2, keepdims=True)                 # [N, S, 1]
    var = (jnp.sum(row_sq, axis=1, keepdims=True)
           + float(S) * jnp.sum(dc * dc, axis=2, keepdims=True)) * inv_n
    rstd = lax.rsqrt(var + eps)                                      # [N, 1, 1]

    xn_x = (dx * rstd) * lnx_ref[0] + lnx_ref[1]                     # [N, S, C_in]
    xn_c = (dc * rstd) * lnc_ref[0] + lnc_ref[1]                     # [N, S, C_out]

    # Packed weight slabs, sliced at sublane-aligned static offsets.
    w_px = wpw2_ref[0:C_in, :]                      # [C_in, C_out]   projection (x part)
    w2 = wpw2_ref[C_in:, :]                         # [F, C_out]      fc2 weight
    w1x = w1b_ref[0:C_in, :]                        # [C_in, F]       fc1 weight (x part)
    w1c = w1b_ref[C_in:C_cat, :]                    # [C_out, F]      fc1 weight (cond part)
    b1 = w1b_ref[C_cat:C_cat + 1, :]                # [1, F]          fc1 bias

    # Fused matmuls with M = N*S rows (leading-dim merge only; lane dim unchanged).
    x2 = x3.reshape(NS, C_in)
    h = (jnp.dot(xn_x.reshape(NS, C_in), w1x, preferred_element_type=jnp.float32)
         + jnp.dot(xn_c.reshape(NS, C_out), w1c, preferred_element_type=jnp.float32)
         + b1)                                                       # [NS, F]
    h = jnp.maximum(h, 0.0)
    y = jnp.dot(h, w2, preferred_element_type=jnp.float32)           # [NS, C_out]
    xp = jnp.dot(x2, w_px, preferred_element_type=jnp.float32)       # [NS, C_out]
    out = xp + y + rbias                                             # [NS, C_out]

    # Assemble the lane-dense [N, S*C_out] output slab (dense VMEM block +
    # contiguous HBM write-back) via a small VMEM scratch.
    buf_ref[...] = out.reshape(N, S, C_out)
    for s in range(S):
        o_ref[0, :, s * C_out:(s + 1) * C_out] = buf_ref[:, s, :].astype(o_ref.dtype)


def conditional_market_info_mixer(x, x_t, p, *, eps=1e-5):
    B, N, S, C_in = x.shape
    C_out = p["w_ct"].shape[1]
    C_cat = C_in + C_out

    # Hoisted rank-1 conditional branch (per batch; torch recomputes it per (n, s)).
    cond = x_t @ p["w_ct"] + p["b_ct"]                       # [B, C_out]
    rbias = cond @ p["w_p_c"] + p["b_p"] + p["b2"]           # [B, C_out]
    cb = jnp.stack([cond, rbias], axis=1)                    # [B, 2, C_out]

    # Packed constant slabs (few, larger resident VMEM inputs; re-DMA skipped
    # across grid steps because their block index never changes).
    wpw2 = jnp.concatenate([p["w_p_x"], p["w2"]], axis=0)            # [C_in + F, C_out]
    w1b = jnp.concatenate([p["w1_x"], p["w1_c"], p["b1"]], axis=0)   # [C_cat + 1, F]
    lnx = jnp.stack([p["ln_w_x"], p["ln_b_x"]], axis=0)              # [2, S, C_in]
    lnc = jnp.stack([p["ln_w_c"], p["ln_b_c"]], axis=0)              # [2, S, C_out]

    def const_spec(a):
        return pl.BlockSpec(a.shape, lambda b, nd=a.ndim: (0,) * nd)

    kernel = functools.partial(_cmi_kernel, eps=eps)
    out = pl.pallas_call(
        kernel,
        out_shape=jax.ShapeDtypeStruct((B, N, S * C_out), x.dtype),
        grid_spec=pltpu.PrefetchScalarGridSpec(
            num_scalar_prefetch=0,
            grid=(B,),
            in_specs=[
                pl.BlockSpec((1, N, S, C_in), lambda b: (b, 0, 0, 0)),
                pl.BlockSpec((1, 2, C_out), lambda b: (b, 0, 0)),
                const_spec(wpw2), const_spec(w1b),
                const_spec(lnx), const_spec(lnc),
            ],
            out_specs=pl.BlockSpec((1, N, S * C_out), lambda b: (b, 0, 0)),
            scratch_shapes=[pltpu.VMEM((N, S, C_out), jnp.float32)],
        ),
        compiler_params=pltpu.CompilerParams(
            dimension_semantics=("parallel",)),
    )(x, cb, wpw2, w1b, lnx, lnc)
    return out.reshape(B, N, S, C_out)


def reference(x, x_t, p, eps=1e-5):
    """Pure-JAX mirror of the PyTorch forward (sanity check)."""
    B, N, S, C_in = x.shape
    cond = x_t @ p["w_ct"] + p["b_ct"][0]
    C_out = cond.shape[-1]
    cond_b = jnp.broadcast_to(cond[:, None, None, :], (B, N, S, C_out))
    xc = jnp.concatenate([x, cond_b], axis=-1)
    w_p = jnp.concatenate([p["w_p_x"], p["w_p_c"]], axis=0)
    x_proj = xc @ w_p + p["b_p"][0]
    mean = jnp.mean(xc, axis=(-2, -1), keepdims=True)
    var = jnp.mean((xc - mean) ** 2, axis=(-2, -1), keepdims=True)
    ln_w = jnp.concatenate([p["ln_w_x"], p["ln_w_c"]], axis=1)
    ln_b = jnp.concatenate([p["ln_b_x"], p["ln_b_c"]], axis=1)
    xn = (xc - mean) / jnp.sqrt(var + eps) * ln_w + ln_b
    w1 = jnp.concatenate([p["w1_x"], p["w1_c"]], axis=0)
    h = jax.nn.relu(xn @ w1 + p["b1"][0])
    return x_proj + h @ p["w2"] + p["b2"][0]


def make_params(key, *, S, C_in, C_out, C_static, F):
    C_cat = C_in + C_out
    ks = jax.random.split(key, 10)
    n = lambda k, shp, s=0.1: (s * jax.random.normal(k, shp)).astype(jnp.float32)
    return {
        # conditional_transfer: Linear(C_static -> C_out), stored as (in, out)
        "w_ct": n(ks[0], (C_static, C_out)),
        "b_ct": n(ks[1], (1, C_out)),
        # projection: Linear(C_cat -> C_out), rows split into x / cond parts
        "w_p_x": n(ks[2], (C_in, C_out)),
        "w_p_c": n(ks[2], (C_cat, C_out))[C_in:],   # same draw, contiguous split
        "b_p": n(ks[3], (1, C_out)),
        # LayerNorm((S, C_cat)) affine params, split along the channel axis
        "ln_w_x": 1.0 + n(ks[4], (S, C_in), 0.05),
        "ln_w_c": 1.0 + n(ks[4], (S, C_cat), 0.05)[:, C_in:],
        "ln_b_x": n(ks[5], (S, C_in), 0.05),
        "ln_b_c": n(ks[5], (S, C_cat), 0.05)[:, C_in:],
        # fc1: Linear(C_cat -> F)
        "w1_x": n(ks[6], (C_in, F)),
        "w1_c": n(ks[6], (C_cat, F))[C_in:],
        "b1": n(ks[7], (1, F)),
        # fc2: Linear(F -> C_out)
        "w2": n(ks[8], (F, C_out)),
        "b2": n(ks[9], (1, C_out)),
    }


if __name__ == "__main__":
    B, N, S = 2, 4, 8            # batch, groups, sequence_length
    C_in, C_out = 8, 16          # input_channels, output_channels  (S*C_out = 128 lanes)
    C_static, F = 6, 32          # static_channels, ff_dim

    key = jax.random.PRNGKey(0)
    kx, kt, kp = jax.random.split(key, 3)
    x = jax.random.normal(kx, (B, N, S, C_in), dtype=jnp.float32)
    x_t = jax.random.normal(kt, (B, C_static), dtype=jnp.float32)
    params = make_params(kp, S=S, C_in=C_in, C_out=C_out, C_static=C_static, F=F)

    mixer = jax.jit(conditional_market_info_mixer)
    out = jax.block_until_ready(mixer(x, x_t, params))

    ref = reference(x, x_t, params)
    assert out.shape == (B, N, S, C_out)
    assert jnp.allclose(out, ref, rtol=1e-4, atol=1e-4), "mismatch vs JAX reference"

    print("KERNEL_OK")
</pallas_src>

<mosaic_0001>
module attributes {stable_mosaic.version = 11 : i64} {
  func.func @_cmi_kernel(%arg0: i32, %arg1: memref<1x4x8x8xf32, #tpu.memory_space<vmem>>, %arg2: memref<1x2x16xf32, #tpu.memory_space<vmem>>, %arg3: memref<40x16xf32, #tpu.memory_space<vmem>>, %arg4: memref<25x32xf32, #tpu.memory_space<vmem>>, %arg5: memref<2x8x8xf32, #tpu.memory_space<vmem>>, %arg6: memref<2x8x16xf32, #tpu.memory_space<vmem>>, %arg7: memref<1x4x128xf32, #tpu.memory_space<vmem>>, %arg8: memref<4x8x16xf32, #tpu.memory_space<vmem>>) attributes {dimension_semantics = [#tpu.dimension_semantics<parallel>], iteration_bounds = array<i64: 2>, scalar_prefetch = 0 : i64, scratch_operands = 1 : i64, tpu.core_type = #tpu.core_type<tc>, window_params = [{transform_indices = @transform_0, window_bounds = array<i64: 1, 4, 8, 8>}, {transform_indices = @transform_1, window_bounds = array<i64: 1, 2, 16>}, {pipeline_mode = #tpu.pipeline_mode<synchronous>, transform_indices = @transform_2, window_bounds = array<i64: 40, 16>}, {pipeline_mode = #tpu.pipeline_mode<synchronous>, transform_indices = @transform_3, window_bounds = array<i64: 25, 32>}, {pipeline_mode = #tpu.pipeline_mode<synchronous>, transform_indices = @transform_4, window_bounds = array<i64: 2, 8, 8>}, {pipeline_mode = #tpu.pipeline_mode<synchronous>, transform_indices = @transform_5, window_bounds = array<i64: 2, 8, 16>}, {transform_indices = @transform_6, window_bounds = array<i64: 1, 4, 128>}]} {
    %c0 = arith.constant 0 : index
    %c0_0 = arith.constant 0 : index
    %c0_1 = arith.constant 0 : index
    %c0_2 = arith.constant 0 : index
    %0 = vector.load %arg1[%c0, %c0_0, %c0_1, %c0_2] : memref<1x4x8x8xf32, #tpu.memory_space<vmem>>, vector<1x4x8x8xf32>
    %1 = vector.shape_cast %0 : vector<1x4x8x8xf32> to vector<4x8x8xf32>
    %c0_3 = arith.constant 0 : index
    %c0_4 = arith.constant 0 : index
    %c0_5 = arith.constant 0 : index
    %2 = vector.load %arg2[%c0_3, %c0_4, %c0_5] : memref<1x2x16xf32, #tpu.memory_space<vmem>>, vector<1x1x16xf32>
    %3 = vector.shape_cast %2 : vector<1x1x16xf32> to vector<1x16xf32>
    %c0_6 = arith.constant 0 : index
    %c1 = arith.constant 1 : index
    %c0_7 = arith.constant 0 : index
    %4 = vector.load %arg2[%c0_6, %c1, %c0_7] : memref<1x2x16xf32, #tpu.memory_space<vmem>>, vector<1x1x16xf32>
    %5 = vector.shape_cast %4 : vector<1x1x16xf32> to vector<1x16xf32>
    %6 = vector.shape_cast %3 : vector<1x16xf32> to vector<1x1x16xf32>
    %cst = arith.constant dense<0.000000e+00> : vector<1xf32>
    %7 = vector.multi_reduction <add>, %6, %cst [1, 2] : vector<1x1x16xf32> to vector<1xf32>
    %8 = vector.shape_cast %7 : vector<1xf32> to vector<1x1x1xf32>
    %9 = vector.extract %8[0, 0, 0] : f32 from vector<1x1x1xf32>
    %cst_8 = arith.constant dense<0.000000e+00> : vector<4x8xf32>
    %10 = vector.multi_reduction <add>, %1, %cst_8 [2] : vector<4x8x8xf32> to vector<4x8xf32>
    %11 = vector.shape_cast %10 : vector<4x8xf32> to vector<4x8x1xf32>
    %cst_9 = arith.constant dense<0.000000e+00> : vector<4x1xf32>
    %12 = vector.multi_reduction <add>, %11, %cst_9 [1] : vector<4x8x1xf32> to vector<4x1xf32>
    %13 = vector.shape_cast %12 : vector<4x1xf32> to vector<4x1x1xf32>
    %cst_10 = arith.constant 8.000000e+00 : f32
    %14 = arith.mulf %cst_10, %9 : f32
    %15 = vector.broadcast %14 : f32 to vector<4x1x1xf32>
    %16 = arith.addf %13, %15 : vector<4x1x1xf32>
    %cst_11 = arith.constant 0.00520833349 : f32
    %17 = vector.broadcast %cst_11 : f32 to vector<4x1x1xf32>
    %18 = arith.mulf %16, %17 : vector<4x1x1xf32>
    %19 = vector.broadcast %18 : vector<4x1x1xf32> to vector<4x8x8xf32>
    %20 = arith.subf %1, %19 : vector<4x8x8xf32>
    %21 = vector.shape_cast %3 : vector<1x16xf32> to vector<1x1x16xf32>
    %22 = vector.broadcast %21 : vector<1x1x16xf32> to vector<4x1x16xf32>
    %23 = vector.broadcast %18 : vector<4x1x1xf32> to vector<4x1x16xf32>
    %24 = arith.subf %22, %23 : vector<4x1x16xf32>
    %25 = arith.mulf %20, %20 : vector<4x8x8xf32>
    %cst_12 = arith.constant dense<0.000000e+00> : vector<4x8xf32>
    %26 = vector.multi_reduction <add>, %25, %cst_12 [2] : vector<4x8x8xf32> to vector<4x8xf32>
    %27 = vector.shape_cast %26 : vector<4x8xf32> to vector<4x8x1xf32>
    %cst_13 = arith.constant dense<0.000000e+00> : vector<4x1xf32>
    %28 = vector.multi_reduction <add>, %27, %cst_13 [1] : vector<4x8x1xf32> to vector<4x1xf32>
    %29 = vector.shape_cast %28 : vector<4x1xf32> to vector<4x1x1xf32>
    %30 = arith.mulf %24, %24 : vector<4x1x16xf32>
    %cst_14 = arith.constant dense<0.000000e+00> : vector<4x1xf32>
    %31 = vector.multi_reduction <add>, %30, %cst_14 [2] : vector<4x1x16xf32> to vector<4x1xf32>
    %32 = vector.shape_cast %31 : vector<4x1xf32> to vector<4x1x1xf32>
    %cst_15 = arith.constant 8.000000e+00 : f32
    %33 = vector.broadcast %cst_15 : f32 to vector<4x1x1xf32>
    %34 = arith.mulf %33, %32 : vector<4x1x1xf32>
    %35 = arith.addf %29, %34 : vector<4x1x1xf32>
    %cst_16 = arith.constant 0.00520833349 : f32
    %36 = vector.broadcast %cst_16 : f32 to vector<4x1x1xf32>
    %37 = arith.mulf %35, %36 : vector<4x1x1xf32>
    %cst_17 = arith.constant 9.99999974E-6 : f32
    %38 = vector.broadcast %cst_17 : f32 to vector<4x1x1xf32>
    %39 = arith.addf %37, %38 : vector<4x1x1xf32>
    %40 = math.rsqrt %39 : vector<4x1x1xf32>
    %41 = vector.broadcast %40 : vector<4x1x1xf32> to vector<4x8x8xf32>
    %42 = arith.mulf %20, %41 : vector<4x8x8xf32>
    %c0_18 = arith.constant 0 : index
    %c0_19 = arith.constant 0 : index
    %c0_20 = arith.constant 0 : index
    %43 = vector.load %arg5[%c0_18, %c0_19, %c0_20] : memref<2x8x8xf32, #tpu.memory_space<vmem>>, vector<1x8x8xf32>
    %44 = vector.shape_cast %43 : vector<1x8x8xf32> to vector<8x8xf32>
    %45 = vector.shape_cast %44 : vector<8x8xf32> to vector<1x8x8xf32>
    %46 = vector.broadcast %45 : vector<1x8x8xf32> to vector<4x8x8xf32>
    %47 = arith.mulf %42, %46 : vector<4x8x8xf32>
    %c1_21 = arith.constant 1 : index
    %c0_22 = arith.constant 0 : index
    %c0_23 = arith.constant 0 : index
    %48 = vector.load %arg5[%c1_21, %c0_22, %c0_23] : memref<2x8x8xf32, #tpu.memory_space<vmem>>, vector<1x8x8xf32>
    %49 = vector.shape_cast %48 : vector<1x8x8xf32> to vector<8x8xf32>
    %50 = vector.shape_cast %49 : vector<8x8xf32> to vector<1x8x8xf32>
    %51 = vector.broadcast %50 : vector<1x8x8xf32> to vector<4x8x8xf32>
    %52 = arith.addf %47, %51 : vector<4x8x8xf32>
    %53 = vector.broadcast %40 : vector<4x1x1xf32> to vector<4x1x16xf32>
    %54 = arith.mulf %24, %53 : vector<4x1x16xf32>
    %c0_24 = arith.constant 0 : index
    %c0_25 = arith.constant 0 : index
    %c0_26 = arith.constant 0 : index
    %55 = vector.load %arg6[%c0_24, %c0_25, %c0_26] : memref<2x8x16xf32, #tpu.memory_space<vmem>>, vector<1x8x16xf32>
    %56 = vector.shape_cast %55 : vector<1x8x16xf32> to vector<8x16xf32>
    %57 = vector.shape_cast %56 : vector<8x16xf32> to vector<1x8x16xf32>
    %58 = vector.broadcast %54 : vector<4x1x16xf32> to vector<4x8x16xf32>
    %59 = vector.broadcast %57 : vector<1x8x16xf32> to vector<4x8x16xf32>
    %60 = arith.mulf %58, %59 : vector<4x8x16xf32>
    %c1_27 = arith.constant 1 : index
    %c0_28 = arith.constant 0 : index
    %c0_29 = arith.constant 0 : index
    %61 = vector.load %arg6[%c1_27, %c0_28, %c0_29] : memref<2x8x16xf32, #tpu.memory_space<vmem>>, vector<1x8x16xf32>
    %62 = vector.shape_cast %61 : vector<1x8x16xf32> to vector<8x16xf32>
    %63 = vector.shape_cast %62 : vector<8x16xf32> to vector<1x8x16xf32>
    %64 = vector.broadcast %63 : vector<1x8x16xf32> to vector<4x8x16xf32>
    %65 = arith.addf %60, %64 : vector<4x8x16xf32>
    %c0_30 = arith.constant 0 : index
    %c0_31 = arith.constant 0 : index
    %66 = vector.load %arg3[%c0_30, %c0_31] : memref<40x16xf32, #tpu.memory_space<vmem>>, vector<8x16xf32>
    %c8 = arith.constant 8 : index
    %c0_32 = arith.constant 0 : index
    %67 = vector.load %arg3[%c8, %c0_32] : memref<40x16xf32, #tpu.memory_space<vmem>>, vector<32x16xf32>
    %c0_33 = arith.constant 0 : index
    %c0_34 = arith.constant 0 : index
    %68 = vector.load %arg4[%c0_33, %c0_34] : memref<25x32xf32, #tpu.memory_space<vmem>>, vector<8x32xf32>
    %c8_35 = arith.constant 8 : index
    %c0_36 = arith.constant 0 : index
    %69 = vector.load %arg4[%c8_35, %c0_36] : memref<25x32xf32, #tpu.memory_space<vmem>>, vector<16x32xf32>
    %c24 = arith.constant 24 : index
    %c0_37 = arith.constant 0 : index
    %70 = vector.load %arg4[%c24, %c0_37] : memref<25x32xf32, #tpu.memory_space<vmem>>, vector<1x32xf32>
    %71 = vector.shape_cast %1 : vector<4x8x8xf32> to vector<32x8xf32>
    %72 = vector.shape_cast %52 : vector<4x8x8xf32> to vector<32x8xf32>
    %cst_38 = arith.constant dense<0.000000e+00> : vector<32x32xf32>
    %73 = tpu.matmul %72, %68, %cst_38 {dimension_numbers = #tpu.dot_dimension_numbers<[1], [0], [0], [1], [0, 0, 1, 1], [], []>} : vector<32x8xf32>, vector<8x32xf32>, vector<32x32xf32> -> vector<32x32xf32>
    %74 = vector.shape_cast %65 : vector<4x8x16xf32> to vector<32x16xf32>
    %cst_39 = arith.constant dense<0.000000e+00> : vector<32x32xf32>
    %75 = tpu.matmul %74, %69, %cst_39 {dimension_numbers = #tpu.dot_dimension_numbers<[1], [0], [0], [1], [0, 0, 1, 1], [], []>} : vector<32x16xf32>, vector<16x32xf32>, vector<32x32xf32> -> vector<32x32xf32>
    %76 = arith.addf %73, %75 : vector<32x32xf32>
    %77 = vector.broadcast %70 : vector<1x32xf32> to vector<32x32xf32>
    %78 = arith.addf %76, %77 : vector<32x32xf32>
    %cst_40 = arith.constant 0.000000e+00 : f32
    %79 = vector.broadcast %cst_40 : f32 to vector<32x32xf32>
    %80 = arith.maximumf %78, %79 : vector<32x32xf32>
    %cst_41 = arith.constant dense<0.000000e+00> : vector<32x16xf32>
    %81 = tpu.matmul %80, %67, %cst_41 {dimension_numbers = #tpu.dot_dimension_numbers<[1], [0], [0], [1], [0, 0, 1, 1], [], []>} : vector<32x32xf32>, vector<32x16xf32>, vector<32x16xf32> -> vector<32x16xf32>
    %cst_42 = arith.constant dense<0.000000e+00> : vector<32x16xf32>
    %82 = tpu.matmul %71, %66, %cst_42 {dimension_numbers = #tpu.dot_dimension_numbers<[1], [0], [0], [1], [0, 0, 1, 1], [], []>} : vector<32x8xf32>, vector<8x16xf32>, vector<32x16xf32> -> vector<32x16xf32>
    %83 = arith.addf %82, %81 : vector<32x16xf32>
    %84 = vector.broadcast %5 : vector<1x16xf32> to vector<32x16xf32>
    %85 = arith.addf %83, %84 : vector<32x16xf32>
    %86 = vector.shape_cast %85 : vector<32x16xf32> to vector<4x8x16xf32>
    %c0_43 = arith.constant 0 : index
    %c0_44 = arith.constant 0 : index
    %c0_45 = arith.constant 0 : index
    %87 = vector.load %arg8[%c0_43, %c0_44, %c0_45] : memref<4x8x16xf32, #tpu.memory_space<vmem>>, vector<4x8x16xf32>
    tpu.vector_store %arg8[%c0_43, %c0_44, %c0_45], %86 {strides = array<i32>} : memref<4x8x16xf32, #tpu.memory_space<vmem>>, vector<4x8x16xf32>,
    %c0_46 = arith.constant 0 : index
    %c0_47 = arith.constant 0 : index
    %c0_48 = arith.constant 0 : index
    %88 = vector.load %arg8[%c0_46, %c0_47, %c0_48] : memref<4x8x16xf32, #tpu.memory_space<vmem>>, vector<4x1x16xf32>
    %89 = vector.shape_cast %88 : vector<4x1x16xf32> to vector<4x16xf32>
    %c0_49 = arith.constant 0 : index
    %c0_50 = arith.constant 0 : index
    %c0_51 = arith.constant 0 : index
    %90 = vector.load %arg7[%c0_49, %c0_50, %c0_51] : memref<1x4x128xf32, #tpu.memory_space<vmem>>, vector<1x4x16xf32>
    %91 = vector.shape_cast %90 : vector<1x4x16xf32> to vector<4x16xf32>
    %92 = vector.shape_cast %89 : vector<4x16xf32> to vector<1x4x16xf32>
    tpu.vector_store %arg7[%c0_49, %c0_50, %c0_51], %92 {strides = array<i32>} : memref<1x4x128xf32, #tpu.memory_space<vmem>>, vector<1x4x16xf32>,
    %c0_52 = arith.constant 0 : index
    %c1_53 = arith.constant 1 : index
    %c0_54 = arith.constant 0 : index
    %93 = vector.load %arg8[%c0_52, %c1_53, %c0_54] : memref<4x8x16xf32, #tpu.memory_space<vmem>>, vector<4x1x16xf32>
    %94 = vector.shape_cast %93 : vector<4x1x16xf32> to vector<4x16xf32>
    %c0_55 = arith.constant 0 : index
    %c0_56 = arith.constant 0 : index
    %c16 = arith.constant 16 : index
    %95 = vector.load %arg7[%c0_55, %c0_56, %c16] : memref<1x4x128xf32, #tpu.memory_space<vmem>>, vector<1x4x16xf32>
    %96 = vector.shape_cast %95 : vector<1x4x16xf32> to vector<4x16xf32>
    %97 = vector.shape_cast %94 : vector<4x16xf32> to vector<1x4x16xf32>
    tpu.vector_store %arg7[%c0_55, %c0_56, %c16], %97 {strides = array<i32>} : memref<1x4x128xf32, #tpu.memory_space<vmem>>, vector<1x4x16xf32>,
    %c0_57 = arith.constant 0 : index
    %c2 = arith.constant 2 : index
    %c0_58 = arith.constant 0 : index
    %98 = vector.load %arg8[%c0_57, %c2, %c0_58] : memref<4x8x16xf32, #tpu.memory_space<vmem>>, vector<4x1x16xf32>
    %99 = vector.shape_cast %98 : vector<4x1x16xf32> to vector<4x16xf32>
    %c0_59 = arith.constant 0 : index
    %c0_60 = arith.constant 0 : index
    %c32 = arith.constant 32 : index
    %100 = vector.load %arg7[%c0_59, %c0_60, %c32] : memref<1x4x128xf32, #tpu.memory_space<vmem>>, vector<1x4x16xf32>
    %101 = vector.shape_cast %100 : vector<1x4x16xf32> to vector<4x16xf32>
    %102 = vector.shape_cast %99 : vector<4x16xf32> to vector<1x4x16xf32>
    tpu.vector_store %arg7[%c0_59, %c0_60, %c32], %102 {strides = array<i32>} : memref<1x4x128xf32, #tpu.memory_space<vmem>>, vector<1x4x16xf32>,
    %c0_61 = arith.constant 0 : index
    %c3 = arith.constant 3 : index
    %c0_62 = arith.constant 0 : index
    %103 = vector.load %arg8[%c0_61, %c3, %c0_62] : memref<4x8x16xf32, #tpu.memory_space<vmem>>, vector<4x1x16xf32>
    %104 = vector.shape_cast %103 : vector<4x1x16xf32> to vector<4x16xf32>
    %c0_63 = arith.constant 0 : index
    %c0_64 = arith.constant 0 : index
    %c48 = arith.constant 48 : index
    %105 = vector.load %arg7[%c0_63, %c0_64, %c48] : memref<1x4x128xf32, #tpu.memory_space<vmem>>, vector<1x4x16xf32>
    %106 = vector.shape_cast %105 : vector<1x4x16xf32> to vector<4x16xf32>
    %107 = vector.shape_cast %104 : vector<4x16xf32> to vector<1x4x16xf32>
    tpu.vector_store %arg7[%c0_63, %c0_64, %c48], %107 {strides = array<i32>} : memref<1x4x128xf32, #tpu.memory_space<vmem>>, vector<1x4x16xf32>,
    %c0_65 = arith.constant 0 : index
    %c4 = arith.constant 4 : index
    %c0_66 = arith.constant 0 : index
    %108 = vector.load %arg8[%c0_65, %c4, %c0_66] : memref<4x8x16xf32, #tpu.memory_space<vmem>>, vector<4x1x16xf32>
    %109 = vector.shape_cast %108 : vector<4x1x16xf32> to vector<4x16xf32>
    %c0_67 = arith.constant 0 : index
    %c0_68 = arith.constant 0 : index
    %c64 = arith.constant 64 : index
    %110 = vector.load %arg7[%c0_67, %c0_68, %c64] : memref<1x4x128xf32, #tpu.memory_space<vmem>>, vector<1x4x16xf32>
    %111 = vector.shape_cast %110 : vector<1x4x16xf32> to vector<4x16xf32>
    %112 = vector.shape_cast %109 : vector<4x16xf32> to vector<1x4x16xf32>
    tpu.vector_store %arg7[%c0_67, %c0_68, %c64], %112 {strides = array<i32>} : memref<1x4x128xf32, #tpu.memory_space<vmem>>, vector<1x4x16xf32>,
    %c0_69 = arith.constant 0 : index
    %c5 = arith.constant 5 : index
    %c0_70 = arith.constant 0 : index
    %113 = vector.load %arg8[%c0_69, %c5, %c0_70] : memref<4x8x16xf32, #tpu.memory_space<vmem>>, vector<4x1x16xf32>
    %114 = vector.shape_cast %113 : vector<4x1x16xf32> to vector<4x16xf32>
    %c0_71 = arith.constant 0 : index
    %c0_72 = arith.constant 0 : index
    %c80 = arith.constant 80 : index
    %115 = vector.load %arg7[%c0_71, %c0_72, %c80] : memref<1x4x128xf32, #tpu.memory_space<vmem>>, vector<1x4x16xf32>
    %116 = vector.shape_cast %115 : vector<1x4x16xf32> to vector<4x16xf32>
    %117 = vector.shape_cast %114 : vector<4x16xf32> to vector<1x4x16xf32>
    tpu.vector_store %arg7[%c0_71, %c0_72, %c80], %117 {strides = array<i32>} : memref<1x4x128xf32, #tpu.memory_space<vmem>>, vector<1x4x16xf32>,
    %c0_73 = arith.constant 0 : index
    %c6 = arith.constant 6 : index
    %c0_74 = arith.constant 0 : index
    %118 = vector.load %arg8[%c0_73, %c6, %c0_74] : memref<4x8x16xf32, #tpu.memory_space<vmem>>, vector<4x1x16xf32>
    %119 = vector.shape_cast %118 : vector<4x1x16xf32> to vector<4x16xf32>
    %c0_75 = arith.constant 0 : index
    %c0_76 = arith.constant 0 : index
    %c96 = arith.constant 96 : index
    %120 = vector.load %arg7[%c0_75, %c0_76, %c96] : memref<1x4x128xf32, #tpu.memory_space<vmem>>, vector<1x4x16xf32>
    %121 = vector.shape_cast %120 : vector<1x4x16xf32> to vector<4x16xf32>
    %122 = vector.shape_cast %119 : vector<4x16xf32> to vector<1x4x16xf32>
    tpu.vector_store %arg7[%c0_75, %c0_76, %c96], %122 {strides = array<i32>} : memref<1x4x128xf32, #tpu.memory_space<vmem>>, vector<1x4x16xf32>,
    %c0_77 = arith.constant 0 : index
    %c7 = arith.constant 7 : index
    %c0_78 = arith.constant 0 : index
    %123 = vector.load %arg8[%c0_77, %c7, %c0_78] : memref<4x8x16xf32, #tpu.memory_space<vmem>>, vector<4x1x16xf32>
    %124 = vector.shape_cast %123 : vector<4x1x16xf32> to vector<4x16xf32>
    %c0_79 = arith.constant 0 : index
    %c0_80 = arith.constant 0 : index
    %c112 = arith.constant 112 : index
    %125 = vector.load %arg7[%c0_79, %c0_80, %c112] : memref<1x4x128xf32, #tpu.memory_space<vmem>>, vector<1x4x16xf32>
    %126 = vector.shape_cast %125 : vector<1x4x16xf32> to vector<4x16xf32>
    %127 = vector.shape_cast %124 : vector<4x16xf32> to vector<1x4x16xf32>
    tpu.vector_store %arg7[%c0_79, %c0_80, %c112], %127 {strides = array<i32>} : memref<1x4x128xf32, #tpu.memory_space<vmem>>, vector<1x4x16xf32>,
    return
  }
  func.func @transform_0(%arg0: i32) -> (i32, i32, i32, i32) {
    %c0_i32 = arith.constant 0 : i32
    %c0_i32_0 = arith.constant 0 : i32
    %c0_i32_1 = arith.constant 0 : i32
    %c0_i32_2 = arith.constant 0 : i32
    return %arg0, %c0_i32, %c0_i32_0, %c0_i32_1 : i32, i32, i32, i32
  }
  func.func @transform_1(%arg0: i32) -> (i32, i32, i32) {
    %c0_i32 = arith.constant 0 : i32
    %c0_i32_0 = arith.constant 0 : i32
    %c0_i32_1 = arith.constant 0 : i32
    return %arg0, %c0_i32, %c0_i32_0 : i32, i32, i32
  }
  func.func @transform_2(%arg0: i32) -> (i32, i32) {
    %c0_i32 = arith.constant 0 : i32
    %c0_i32_0 = arith.constant 0 : i32
    %c0_i32_1 = arith.constant 0 : i32
    return %c0_i32, %c0_i32_0 : i32, i32
  }
  func.func @transform_3(%arg0: i32) -> (i32, i32) {
    %c0_i32 = arith.constant 0 : i32
    %c0_i32_0 = arith.constant 0 : i32
    %c0_i32_1 = arith.constant 0 : i32
    return %c0_i32, %c0_i32_0 : i32, i32
  }
  func.func @transform_4(%arg0: i32) -> (i32, i32, i32) {
    %c0_i32 = arith.constant 0 : i32
    %c0_i32_0 = arith.constant 0 : i32
    %c0_i32_1 = arith.constant 0 : i32
    %c0_i32_2 = arith.constant 0 : i32
    return %c0_i32, %c0_i32_0, %c0_i32_1 : i32, i32, i32
  }
  func.func @transform_5(%arg0: i32) -> (i32, i32, i32) {
    %c0_i32 = arith.constant 0 : i32
    %c0_i32_0 = arith.constant 0 : i32
    %c0_i32_1 = arith.constant 0 : i32
    %c0_i32_2 = arith.constant 0 : i32
    return %c0_i32, %c0_i32_0, %c0_i32_1 : i32, i32, i32
  }
  func.func @transform_6(%arg0: i32) -> (i32, i32, i32) {
    %c0_i32 = arith.constant 0 : i32
    %c0_i32_0 = arith.constant 0 : i32
    %c0_i32_1 = arith.constant 0 : i32
    return %arg0, %c0_i32, %c0_i32_0 : i32, i32, i32
  }
}

</mosaic_0001>

<bundles_post_ra>
// kernel: conditional_market_info_mixer.1
= control target key start
LH: loop header
LB: loop body
LE: loop exit
PB: predicated region body
PF: predicated region fallthrough
CT: control target
= control target key end

     0   :  { %s1309_s21 = smov 0   ;;  %s1512_s0 = inlined_call_operand.vmem [shape: f32[2,4,8,8], index: 0, kind: input, shape index: {}]   ;;  %s1513_s1 = inlined_call_operand.vmem [shape: f32[2,2,16], index: 1, kind: input, shape index: {}]   ;;  %s1514_s2 = inlined_call_operand.vmem [shape: f32[40,16], index: 2, kind: input, shape index: {}]   ;;  %s1515_s3 = inlined_call_operand.vmem [shape: f32[25,32], index: 3, kind: input, shape index: {}]   ;;  %s1516_s4 = inlined_call_operand.vmem [shape: f32[2,8,8], index: 4, kind: input, shape index: {}]   ;;  %s1517_s5 = inlined_call_operand.vmem [shape: f32[2,8,16], index: 5, kind: input, shape index: {}]   ;;  %s1518_s6 = inlined_call_operand.vmem [shape: f32[2,4,128], index: 6, kind: output, shape index: {}]  }
   0x1 LB: > { %s1118_s22 = sadd.s32 4294967295, %s1265_s21   ;;  %p1122_p0 = scmp.ge.s32.totalorder %s1265_s21, 1  ;;  %s1265_s21 = sphi %s1309_s21, %s16_s21  }
   0x2   : > { %p221_p1 = scmp.lt.s32.totalorder %s1265_s21, 3 }
   0x4   : > { %p222_p2 = pnand %p1122_p0, %p221_p1 }
   0x5   : > { %p254_p3 = scmp.lt.s32.totalorder (!%p222_p2), %s1118_s22, 1  ;;  %vm273_vm0 = vcmask (!%p222_p2), 122880   ;;  %vm284_vm1 = vcmask (!%p222_p2), 64512   ;;  %vm486_vm2 = vcmask (!%p222_p2), 130048   ;;  %vm693_vm3 = vcmask (!%p222_p2), 261120   ;;  %s1268_s14 = smov (!%p222_p2), 16  }
   0x6   : > { %225 = sbr.rel (%p222_p2) target bundleno = 1011 (0x3f3), region = 44  ;;  %vm909_vm4 = vcmask (!%p222_p2), 1041409   ;;  %vm912_vm5 = vcmask (!%p222_p2), 1042434   ;;  %vm915_vm6 = vcmask (!%p222_p2), 1043459   ;;  %s1269_s16 = smov (!%p222_p2), 96   ;;  %vm918_vm7 = vcmask (!%p222_p2), 125952  }
   0x7   : > { %s1270_s17 = smov (!%p222_p2), 48   ;;  %s1271_s20 = smov (!%p222_p2), 64   ;;  %vm937_vm8 = vcmask (!%p222_p2), 257152   ;;  %vm956_vm9 = vcmask (!%p222_p2), 388352   ;;  %vm975_vm10 = vcmask (!%p222_p2), 519552   ;;  %vm994_vm11 = vcmask (!%p222_p2), 650752  }
   0x8   : > { %s1273_s24 = smov (!%p222_p2), 112   ;;  %vm1013_vm12 = vcmask (!%p222_p2), 781952   ;;  %vm1032_vm13 = vcmask (!%p222_p2), 913152   ;;  %vm1051_vm14 = vcmask (!%p222_p2), 1044352  }
   0xd   : > { %s1520_s22 = smov (!%p254_p3, %s1118_s22), 1 }
   0xe   : > { %s1125_s23 = sshll.u32 %s1520_s22, 1  ;;  %s1149_s27 = sshll.u32 %s1520_s22, 5 }
   0xf   : > { %s1323_s26 = scalar_lea.vmem %s1513_s1, %s1125_s23  ;;  %s258_s30 = scalar_lea.vmem %s1512_s0, %s1149_s27 }
  0x10   : > { %v1326_v0 = vld [vmem:[%s1323_s26] sm:$0x1]  ;;  %v1334_v2 = vld [vmem:[%s258_s30 + $0x8] sm:$0xff]  ;;  %v1338_v4 = vld [vmem:[%s258_s30 + $0x10] sm:$0xff]  ;;  %s1126_s15 = sshll.u32 %s1520_s22, 2  ;;  %s1272_s23 = smov 80  }
  0x11   : > { %v274_v1 = vsel %vm273_vm0, %v1326_v0, 0.0  ;;  %v1336_v3 = vld [vmem:[%s258_s30] sm:$0xff]  ;;  %v288_v5 = vsel %vm284_vm1, %v1334_v2, 0.0  ;;  %v1344_v7 = vld [vmem:[%s258_s30 + $0x18] sm:$0xff]  ;;  %v291_v8 = vsel %vm284_vm1, %v1338_v4, 0.0  ;;  %s1489_s19 = scalar_lea.vmem %s1518_s6, %s1126_s15 }
  0x12   : > { %275 = vadd.xlane.f32.xlu0 %v274_v1  ;;  %v285_v6 = vsel %vm284_vm1, %v1336_v3, 0.0  ;;  %289 = vadd.xlane.f32.xlu1 %v288_v5  ;;  %v294_v9 = vsel %vm284_vm1, %v1344_v7, 0.0 }
  0x16   : > { %286 = vadd.xlane.f32.xlu0 %v285_v6  ;;  %292 = vadd.xlane.f32.xlu1 %v291_v8 }
  0x1a   : > { %295 = vadd.xlane.f32.xlu0 %v294_v9 }
  0x9f   : > { %v276_v10 = vpop.xlane.xlu0 %275  ;;  %v290_v18 = vpop.xlane.xlu1 %289 }
  0xa0   : > { %v277_v11 = vrot.slane %v276_v10, 4  ;;  %v303_v22 = vrot.slane %v290_v18, 4 }
  0xa2   : > { %v278_v12 = vadd.f32 %v277_v11, %v276_v10  ;;  %v304_v26 = vadd.f32 %v303_v22, %v290_v18  ;;  %v483_v18 = vld [vmem:[%s1515_s3 + $0x8] sm:$0xff] }
  0xa3   : > { %v287_v17 = vpop.xlane.xlu0 %286  ;;  %v293_v20 = vpop.xlane.xlu1 %292  ;;  %v478_v22 = vld [vmem:[%s1514_s2 + $0x8] sm:$0xff] }
  0xa4   : > { %v279_v13 = vrot.slane %v278_v12, 2  ;;  %v297_v23 = vrot.slane %v287_v17, 4  ;;  %v309_v24 = vrot.slane %v293_v20, 4  ;;  %v305_v30 = vrot.slane %v304_v26, 2 }
  0xa6   : > { %v280_v14 = vadd.f32 %v279_v13, %v278_v12  ;;  %v298_v27 = vadd.f32 %v297_v23, %v287_v17  ;;  %v310_v28 = vadd.f32 %v309_v24, %v293_v20  ;;  %v306_v34 = vadd.f32 %v305_v30, %v304_v26  ;;  %v479_v23 = vld [vmem:[%s1514_s2 + $0x10] sm:$0xff] }
  0xa7   : > { %v296_v19 = vpop.xlane.xlu0 %295  ;;  %v1218_v24 = vpack.c.bf16 %v479_v23, %v478_v22 }
  0xa8   : > { %v281_v15 = vrot.slane %v280_v14, 1  ;;  %v315_v21 = vrot.slane %v296_v19, 4  ;;  %v299_v31 = vrot.slane %v298_v27, 2  ;;  %v311_v32 = vrot.slane %v310_v28, 2 }
  0xa9   : > { %v307_v38 = vrot.slane %v306_v34, 1  ;;  %1219 = vmatprep.subr.bf16.mxu1 %v1218_v24 }
  0xaa   : > { %v282_v16 = vadd.f32 %v281_v15, %v280_v14  ;;  %v316_v25 = vadd.f32 %v315_v21, %v296_v19  ;;  %v300_v35 = vadd.f32 %v299_v31, %v298_v27  ;;  %v312_v36 = vadd.f32 %v311_v32, %v310_v28  ;;  %v484_v19 = vld [vmem:[%s1515_s3 + $0x10] sm:$0xff]  ;;  %v1407_v21 = vld [vmem:[%s1515_s3] sm:$0xff]  ;;  %1221 = vmatpush3.bf16.msra.mxu1 %v1218_v24 }
  0xab   : > { %v308_v42 = vadd.f32 %v307_v38, %v306_v34  ;;  %v1214_v20 = vpack.c.bf16 %v484_v19, %v483_v18 }
  0xac   : > { %1234 = vpush %v282_v16  ;;  %v317_v29 = vrot.slane %v316_v25, 2  ;;  %v301_v39 = vrot.slane %v300_v35, 1  ;;  %v313_v40 = vrot.slane %v312_v36, 1 }
  0xad   : > { %1215 = vmatprep.subr.bf16.mxu0 %v1214_v20 }
  0xae   : > { %v318_v33 = vadd.f32 %v317_v29, %v316_v25  ;;  %v302_v43 = vadd.f32 %v301_v39, %v300_v35  ;;  %v314_v44 = vadd.f32 %v313_v40, %v312_v36  ;;  %1217 = vmatpush3.bf16.msra.mxu0 %v1214_v20 }
  0xaf   : > { %1184 = vmatprep.subr.mxu0 %v1407_v21 }
  0xb0   : > { %v319_v37 = vrot.slane %v318_v33, 1 }
  0xb2   : > { %v320_v41 = vadd.f32 %v319_v37, %v318_v33 }
  0xdd   : > { %s1235_s7 = spop %1234 }
  0xde   : > { %s321_s8 = smul.f32 8.0, %s1235_s7 }
  0xe0   : > { %v322_v45 = vstv %s321_s8 }
  0xe1   : > { %v323_v46 = vadd.f32 %v322_v45, %v302_v43  ;;  %v324_v47 = vadd.f32 %v322_v45, %v308_v42  ;;  %v325_v48 = vadd.f32 %v322_v45, %v314_v44  ;;  %v326_v49 = vadd.f32 %v322_v45, %v320_v41 }
  0xe3   : > { %v327_v50 = vmul.f32 0.0052083335, %v323_v46  ;;  %v328_v51 = vmul.f32 0.0052083335, %v324_v47  ;;  %v329_v52 = vmul.f32 0.0052083335, %v325_v48 }
  0xe4   : > { %v330_v53 = vmul.f32 0.0052083335, %v326_v49 }
  0xe5   : > { %v1351_v54 = vsub.f32 %v1334_v2, %v328_v51  ;;  %v1354_v55 = vsub.f32 %v1336_v3, %v327_v50  ;;  %v1357_v56 = vsub.f32 %v1338_v4, %v329_v52  ;;  %v1367_v60 = vsub.f32 %v1326_v0, %v327_v50 }
  0xe6   : > { %v1360_v57 = vsub.f32 %v1344_v7, %v330_v53  ;;  %v1370_v61 = vsub.f32 %v1326_v0, %v328_v51  ;;  %v1379_v6 = vsub.f32 %v1326_v0, %v329_v52  ;;  %v1382_v8 = vsub.f32 %v1326_v0, %v330_v53 }
  0xe7   : > { %v340_v58 = vmul.f32 %v1351_v54, %v1351_v54  ;;  %v339_v59 = vmul.f32 %v1354_v55, %v1354_v55  ;;  %v341_v1 = vmul.f32 %v1357_v56, %v1357_v56  ;;  %v379_v11 = vmul.f32 %v1367_v60, %v1367_v60 }
  0xe8   : > { %v342_v5 = vmul.f32 %v1360_v57, %v1360_v57  ;;  %v380_v12 = vmul.f32 %v1370_v61, %v1370_v61  ;;  %v381_v0 = vmul.f32 %v1379_v6, %v1379_v6  ;;  %v382_v15 = vmul.f32 %v1382_v8, %v1382_v8 }
  0xe9   : > { %v346_v62 = vsel %vm284_vm1, %v340_v58, 0.0  ;;  %v343_v63 = vsel %vm284_vm1, %v339_v59, 0.0  ;;  %v349_v9 = vsel %vm284_vm1, %v341_v1, 0.0  ;;  %v383_v13 = vsel %vm273_vm0, %v379_v11, 0.0 }
  0xea   : > { %347 = vadd.xlane.f32.xlu0 %v346_v62  ;;  %344 = vadd.xlane.f32.xlu1 %v343_v63  ;;  %v352_v10 = vsel %vm284_vm1, %v342_v5, 0.0  ;;  %v386_v14 = vsel %vm273_vm0, %v380_v12, 0.0  ;;  %v389_v16 = vsel %vm273_vm0, %v381_v0, 0.0  ;;  %v392_v17 = vsel %vm273_vm0, %v382_v15, 0.0 }
  0xee   : > { %350 = vadd.xlane.f32.xlu1 %v349_v9  ;;  %353 = vadd.xlane.f32.xlu0 %v352_v10 }
  0xf2   : > { %384 = vadd.xlane.f32.xlu1 %v383_v13  ;;  %387 = vadd.xlane.f32.xlu0 %v386_v14 }
  0xf6   : > { %390 = vadd.xlane.f32.xlu1 %v389_v16  ;;  %393 = vadd.xlane.f32.xlu0 %v392_v17  ;;  %v415_v17 = vlaneseq }
  0xf8   : > { %v416_v23 = vshrl.u32 %v415_v17, 7 }
  0xfa   : > { %v417_v24 = vsub.s32 0, %v416_v23 }
 0x177   : > { %v345_v25 = vpop.xlane.xlu1 %344  ;;  %v348_v26 = vpop.xlane.xlu0 %347 }
 0x178   : > { %v355_v27 = vrot.slane %v345_v25, 4  ;;  %v361_v28 = vrot.slane %v348_v26, 4 }
 0x17a   : > { %v356_v29 = vadd.f32 %v355_v27, %v345_v25  ;;  %v362_v30 = vadd.f32 %v361_v28, %v348_v26 }
 0x17b   : > { %v351_v31 = vpop.xlane.xlu1 %350  ;;  %v354_v32 = vpop.xlane.xlu0 %353 }
 0x17c   : > { %v357_v33 = vrot.slane %v356_v29, 2  ;;  %v363_v34 = vrot.slane %v362_v30, 2  ;;  %v367_v35 = vrot.slane %v351_v31, 4  ;;  %v373_v36 = vrot.slane %v354_v32, 4 }
 0x17e   : > { %v358_v37 = vadd.f32 %v357_v33, %v356_v29  ;;  %v364_v38 = vadd.f32 %v363_v34, %v362_v30  ;;  %v368_v39 = vadd.f32 %v367_v35, %v351_v31  ;;  %v374_v40 = vadd.f32 %v373_v36, %v354_v32  ;;  %v450_v29 = vld [vmem:[%s1517_s5] sm:$0xff]  ;;  %v1128_v34 = vld [vmem:[%s1517_s5 + $0x8] sm:$0xff] }
 0x17f   : > { %v385_v41 = vpop.xlane.xlu1 %384  ;;  %v388_v42 = vpop.xlane.xlu0 %387 }
 0x180   : > { %v359_v43 = vrot.slane %v358_v37, 1  ;;  %v365_v44 = vrot.slane %v364_v38, 1  ;;  %v369_v45 = vrot.slane %v368_v39, 2  ;;  %v375_v46 = vrot.slane %v374_v40, 2 }
 0x181   : > { %v395_v47 = vmul.f32 8.0, %v385_v41  ;;  %v396_v48 = vmul.f32 8.0, %v388_v42 }
 0x182   : > { %v370_v49 = vadd.f32 %v369_v45, %v368_v39  ;;  %v376_v50 = vadd.f32 %v375_v46, %v374_v40  ;;  %v360_v51 = vadd.f32 %v359_v43, %v358_v37  ;;  %v366_v52 = vadd.f32 %v365_v44, %v364_v38 }
 0x183   : > { %v391_v53 = vpop.xlane.xlu1 %390  ;;  %v394_v58 = vpop.xlane.xlu0 %393 }
 0x184   : > { %v371_v59 = vrot.slane %v370_v49, 1  ;;  %v377_v62 = vrot.slane %v376_v50, 1  ;;  %v399_v63 = vadd.f32 %v395_v47, %v360_v51  ;;  %v400_v1 = vadd.f32 %v396_v48, %v366_v52 }
 0x185   : > { %v397_v5 = vmul.f32 8.0, %v391_v53  ;;  %v398_v9 = vmul.f32 8.0, %v394_v58 }
 0x186   : > { %v403_v10 = vmul.f32 0.0052083335, %v399_v63  ;;  %v404_v11 = vmul.f32 0.0052083335, %v400_v1  ;;  %v372_v12 = vadd.f32 %v371_v59, %v370_v49  ;;  %v378_v13 = vadd.f32 %v377_v62, %v376_v50  ;;  %v1127_v49 = vld [vmem:[%s1516_s4 + $0x8] sm:$0xff]  ;;  %v481_v63 = vld [vmem:[%s1514_s2 + $0x20] sm:$0xff] }
 0x188   : > { %v407_v14 = vadd.f32 1e-05, %v403_v10  ;;  %v408_v0 = vadd.f32 1e-05, %v404_v11  ;;  %v401_v15 = vadd.f32 %v397_v5, %v372_v12  ;;  %v402_v16 = vadd.f32 %v398_v9, %v378_v13  ;;  %v477_v5 = vld [vmem:[%s1514_s2] sm:$0xff] }
 0x189   : > { %v1137_v9 = vld [vmem:[%s1515_s3 + $0x18] ss:$0 sm:$0xff] }
 0x18a   : > { %1251 = vrsqrt.f32 %v407_v14  ;;  %v405_v18 = vmul.f32 0.0052083335, %v401_v15  ;;  %v406_v19 = vmul.f32 0.0052083335, %v402_v16 }
 0x18b   : > { %1253 = vrsqrt.f32 %v408_v0 }
 0x18c   : > { %v409_v20 = vadd.f32 1e-05, %v405_v18  ;;  %v410_v22 = vadd.f32 1e-05, %v406_v19 }
 0x18e   : > { %1255 = vrsqrt.f32 %v409_v20 }
 0x18f   : > { %1257 = vrsqrt.f32 %v410_v22  ;;  %v1146_v22 = vld [vmem:[%s1323_s26 + $0x1] ss:$0 sm:$0xff]  ;;  %s1267_s26 = smov 32  }
 0x194   : > { %v1252_v25 = vpop.eup %1251 }
 0x195   : > { %v1254_v26 = vpop.eup %1253  ;;  %v446_v27 = vmul.f32 %v1252_v25, %v1367_v60  ;;  %v418_v28 = vrot.slane %v1252_v25, %v417_v24 }
 0x196   : > { %v447_v30 = vmul.f32 %v1254_v26, %v1370_v61  ;;  %v422_v33 = vrot.slane %v1254_v26, %v417_v24  ;;  %v435_v61 = vld [vmem:[%s1516_s4] sm:$0xff] }
 0x197   : > { %v454_v31 = vrot.slane %v446_v27, %v417_v24  ;;  %v431_v60 = vmul.f32 %v418_v28, %v1354_v55 }
 0x198   : > { %v1256_v32 = vpop.eup %1255  ;;  %v458_v35 = vrot.slane %v447_v30, %v417_v24  ;;  %v432_v44 = vmul.f32 %v422_v33, %v1351_v54 }
 0x199   : > { %v1258_v36 = vpop.eup %1257  ;;  %v467_v37 = vmul.f32 %v454_v31, %v450_v29  ;;  %v448_v38 = vmul.f32 %v1256_v32, %v1379_v6  ;;  %v426_v39 = vrot.slane %v1256_v32, %v417_v24  ;;  %v436_v55 = vmul.f32 %v435_v61, %v431_v60 }
 0x19a   : > { %v468_v40 = vmul.f32 %v458_v35, %v450_v29  ;;  %v449_v41 = vmul.f32 %v1258_v36, %v1382_v8  ;;  %v430_v47 = vrot.slane %v1258_v36, %v417_v24  ;;  %v437_v51 = vmul.f32 %v435_v61, %v432_v44 }
 0x19b   : > { %v473_v42 = vadd.f32 %v1128_v34, %v467_v37  ;;  %v462_v43 = vrot.slane %v448_v38, %v417_v24  ;;  %v433_v48 = vmul.f32 %v426_v39, %v1357_v56  ;;  %v442_v53 = vadd.f32 %v1127_v49, %v436_v55 }
 0x19c   : > { %v474_v45 = vadd.f32 %v1128_v34, %v468_v40  ;;  %v466_v46 = vrot.slane %v449_v41, %v417_v24  ;;  %v434_v52 = vmul.f32 %v430_v47, %v1360_v57  ;;  %v443_v56 = vadd.f32 %v1127_v49, %v437_v51  ;;  %v480_v57 = vld [vmem:[%s1514_s2 + $0x18] sm:$0xff] }
 0x19d   : > { %1178 = vmatprep.mubr.msk.f32.mxu0 %vm486_vm2, %v473_v42  ;;  %v469_v6 = vmul.f32 %v462_v43, %v450_v29  ;;  %v438_v58 = vmul.f32 %v435_v61, %v433_v48  ;;  %v1222_v1 = vpack.c.bf16 %v481_v63, %v480_v57 }
 0x19e   : > { %1179 = vmatmul.mubr.msk.f32.vlgmr.msra.gmra.mrb[0].mxu0 %vm486_vm2, %v474_v45  ;;  %v470_v8 = vmul.f32 %v466_v46, %v450_v29  ;;  %v439_v59 = vmul.f32 %v435_v61, %v434_v52 }
 0x19f   : > { %1185 = vmatpush3.msra.mxu0 %v1407_v21  ;;  %v475_v50 = vadd.f32 %v1128_v34, %v469_v6  ;;  %v444_v62 = vadd.f32 %v1127_v49, %v438_v58  ;;  %1223 = vmatprep.subr.bf16.mxu1 %v1222_v1 }
 0x1a0   : > { %v476_v54 = vadd.f32 %v1128_v34, %v470_v8  ;;  %v445_v21 = vadd.f32 %v1127_v49, %v439_v59  ;;  %1225 = vmatpush3.bf16.msra.mxu1 %v1222_v1 }
 0x1a1   : > { %1181 = vmatprep.mubr.msk.f32.mxu0 %vm486_vm2, %v475_v50  ;;  %1206 = vmatprep.subr.mxu1 %v477_v5 }
 0x1a2   : > { %1182 = vmatmul.mubr.msk.f32.gmra.mrb[2].mxu0 %vm486_vm2, %v476_v54 }
 0x1a3   : > { %1186 = vmatprep.mubr.msk.f32.mxu0 %vm284_vm1, %v442_v53 }
 0x1a6   : > { %1187 = vmatmul.mubr.msk.f32.vlgmr.msra.gmra.mrb[0].mxu0 %vm284_vm1, %v443_v56 }
 0x1a7   : > { %1189 = vmatprep.mubr.msk.f32.mxu0 %vm284_vm1, %v444_v62 }
 0x1aa   : > { %1190 = vmatmul.mubr.msk.f32.gmra.mrb[2].mxu0 %vm284_vm1, %v445_v21 }
 0x279   : > { %v1188_v10 = vpop.f32.mrb[0].mxu0 }
 0x27a   : > { %v686_v11 = vadd.f32 %v1188_v10, %v1137_v9  ;;  %v662_v12 = vpop.f32.mrb[1].mxu0 }
 0x27b   : > { %v685_v13 = vadd.f32 %v1137_v9, %v662_v12 }
 0x27c   : > { %v690_v15 = vmax.f32 %v686_v11, 0.0 }
 0x27d   : > { %v689_v14 = vmax.f32 %v685_v13, 0.0  ;;  %v1191_v0 = vpop.f32.mrb[2].mxu0 }
 0x27e   : > { %v688_v16 = vadd.f32 %v1191_v0, %v1137_v9  ;;  %v672_v17 = vpop.f32.mrb[3].mxu0 }
 0x27f   : > { %v687_v18 = vadd.f32 %v1137_v9, %v672_v17  ;;  %1200 = vmatprep.mubr.msk.f32.mxu1 %vm693_vm3, %v689_v14 }
 0x280   : > { %1201 = vmatmul.mubr.msk.f32.vlgmr.msra.gmra.mrb[0].mxu1 %vm693_vm3, %v690_v15  ;;  %v692_v20 = vmax.f32 %v688_v16, 0.0 }
 0x281   : > { %v691_v19 = vmax.f32 %v687_v18, 0.0  ;;  %1207 = vmatpush3.msra.mxu1 %v477_v5 }
 0x283   : > { %1203 = vmatprep.mubr.msk.f32.mxu1 %vm693_vm3, %v691_v19 }
 0x284   : > { %1204 = vmatmul.mubr.msk.f32.gmra.mrb[2].mxu1 %vm693_vm3, %v692_v20 }
 0x285   : > { %1208 = vmatprep.mubr.msk.f32.mxu1 %vm284_vm1, %v1336_v3 }
 0x288   : > { %1209 = vmatmul.mubr.msk.f32.vlgmr.msra.gmra.mrb[0].mxu1 %vm284_vm1, %v1334_v2 }
 0x289   : > { %1211 = vmatprep.mubr.msk.f32.mxu1 %vm284_vm1, %v1338_v4 }
 0x28c   : > { %1212 = vmatmul.mubr.msk.f32.gmra.mrb[2].mxu1 %vm284_vm1, %v1344_v7 }
 0x35b   : > { %v1210_v23 = vpop.f32.mrb[0].mxu1 }
 0x35c   : > { %v893_v24 = vadd.f32 %v1210_v23, %v1146_v22  ;;  %v869_v25 = vpop.f32.mrb[1].mxu1 }
 0x35d   : > { %v892_v26 = vadd.f32 %v1146_v22, %v869_v25 }
 0x35e   : > { %897 = vst.msk [vmem:[#allocation2 + $0x8] sm:$0xff] %vm486_vm2, %v893_v24 }
 0x35f   : > { %896 = vst.msk [vmem:[#allocation2] sm:$0xff] %vm486_vm2, %v892_v26  ;;  %v1213_v27 = vpop.f32.mrb[2].mxu1 }
 0x360   : > { %v895_v3 = vadd.f32 %v1213_v27, %v1146_v22  ;;  %v879_v28 = vpop.f32.mrb[3].mxu1 }
 0x361   : > { %v894_v29 = vadd.f32 %v1146_v22, %v879_v28 }
 0x362   : > { %899 = vst.msk [vmem:[#allocation2 + $0x18] sm:$0xff] %vm486_vm2, %v895_v3 }
 0x363   : > { %898 = vst.msk [vmem:[#allocation2 + $0x10] sm:$0xff] %vm486_vm2, %v894_v29 }
 0x365   : > { %v940_v2 = vld [vmem:[#allocation2 + $0xa] sm:$0x1]  ;;  %v921_v4 = vld [vmem:[#allocation2 + $0x9] sm:$0x1]  ;;  %v1016_v7 = vld [vmem:[#allocation2 + $0xe] sm:$0x1] }
 0x366   : > { %v947_v30 = vrot.slane %v940_v2, 7  ;;  %v939_v31 = vld [vmem:[#allocation2 + $0x2] sm:$0x1]  ;;  %v920_v32 = vld [vmem:[#allocation2 + $0x1] sm:$0x1]  ;;  %v928_v34 = vrot.slane %v921_v4, 7 }
 0x367   : > { %v1015_v33 = vld [vmem:[#allocation2 + $0x6] sm:$0x1]  ;;  %v1023_v35 = vrot.slane %v1016_v7, 7  ;;  %v959_v36 = vld [vmem:[#allocation2 + $0xb] sm:$0x1] }
 0x368   : > { %v978_v37 = vld [vmem:[#allocation2 + $0xc] sm:$0x1]  ;;  %v958_v40 = vld [vmem:[#allocation2 + $0x3] sm:$0x1]  ;;  %v948_v61 = vsel %vm909_vm4, %v947_v30, %v939_v31  ;;  %v966_v6 = vrot.slane %v959_v36, 7  ;;  %v929_v55 = vsel %vm909_vm4, %v928_v34, %v920_v32 }
 0x369   : > { %v942_v38 = vld [vmem:[#allocation2 + $0x1a] sm:$0x1]  ;;  %v923_v60 = vld [vmem:[#allocation2 + $0x19] sm:$0x1]  ;;  %v1018_v39 = vld [vmem:[#allocation2 + $0x1e] sm:$0x1]  ;;  %v1024_v48 = vsel %vm909_vm4, %v1023_v35, %v1015_v33 }
 0x36a   : > { %v941_v41 = vld [vmem:[#allocation2 + $0x12] sm:$0x1]  ;;  %v951_v42 = vrot.slane %v942_v38, 5  ;;  %v922_v43 = vld [vmem:[#allocation2 + $0x11] sm:$0x1]  ;;  %v932_v46 = vrot.slane %v923_v60, 5  ;;  %v967_v57 = vsel %vm909_vm4, %v966_v6, %v958_v40 }
 0x36b   : > { %v949_v44 = vrot.slane %v941_v41, 6  ;;  %v930_v45 = vrot.slane %v922_v43, 6  ;;  %v1017_v47 = vld [vmem:[#allocation2 + $0x16] sm:$0x1]  ;;  %v1027_v49 = vrot.slane %v1018_v39, 5  ;;  %v985_v56 = vrot.slane %v978_v37, 7 }
 0x36c   : > { %v1025_v8 = vrot.slane %v1017_v47, 6  ;;  %v960_v50 = vld [vmem:[#allocation2 + $0x13] sm:$0x1]  ;;  %v961_v54 = vld [vmem:[#allocation2 + $0x1b] sm:$0x1] }
 0x36d   : > { %v950_v51 = vsel %vm912_vm5, %v949_v44, %v948_v61  ;;  %v931_v52 = vsel %vm912_vm5, %v930_v45, %v929_v55  ;;  %v968_v53 = vrot.slane %v960_v50, 6  ;;  %v979_v58 = vld [vmem:[#allocation2 + $0x14] sm:$0x1]  ;;  %v977_v63 = vld [vmem:[#allocation2 + $0x4] sm:$0x1]  ;;  %v970_v9 = vrot.slane %v961_v54, 5 }
 0x36e   : > { %v952_v59 = vsel %vm915_vm6, %v951_v42, %v950_v51  ;;  %v933_v62 = vsel %vm915_vm6, %v932_v46, %v931_v52  ;;  %v1026_v21 = vsel %vm912_vm5, %v1025_v8, %v1024_v48  ;;  %v980_v1 = vld [vmem:[#allocation2 + $0x1c] sm:$0x1]  ;;  %v987_v10 = vrot.slane %v979_v58, 6  ;;  %v997_v11 = vld [vmem:[#allocation2 + $0xd] sm:$0x1] }
 0x36f   : > { %953 = vrot.lane.b32.xlu0 %v952_v59, %s1267_s26  ;;  %934 = vrot.lane.b32.xlu1 %v933_v62, %s1268_s14  ;;  %v969_v5 = vsel %vm912_vm5, %v968_v53, %v967_v57  ;;  %v998_v12 = vld [vmem:[#allocation2 + $0x15] sm:$0x1]  ;;  %v1028_v13 = vsel %vm915_vm6, %v1027_v49, %v1026_v21  ;;  %v986_v0 = vsel %vm909_vm4, %v985_v56, %v977_v63  ;;  %v996_v15 = vld [vmem:[#allocation2 + $0x5] sm:$0x1]  ;;  %v989_v17 = vrot.slane %v980_v1, 5 }
 0x370   : > { %v971_v14 = vsel %vm915_vm6, %v970_v9, %v969_v5  ;;  %v988_v16 = vsel %vm912_vm5, %v987_v10, %v986_v0  ;;  %v1004_v18 = vrot.slane %v997_v11, 7  ;;  %v1006_v19 = vrot.slane %v998_v12, 6  ;;  %v1035_v20 = vld [vmem:[#allocation2 + $0xf] sm:$0x1]  ;;  %v900_v22 = vld [vmem:[#allocation2] sm:$0x1] }
 0x371   : > { %v901_v23 = vld [vmem:[#allocation2 + $0x8] sm:$0x1]  ;;  %v903_v24 = vld [vmem:[#allocation2 + $0x18] sm:$0x1]  ;;  %v1036_v25 = vld [vmem:[#allocation2 + $0x17] sm:$0x1]  ;;  %v990_v3 = vsel %vm915_vm6, %v989_v17, %v988_v16 }
 0x372   : > { %v908_v26 = vrot.slane %v901_v23, 7  ;;  %v902_v27 = vld [vmem:[#allocation2 + $0x10] sm:$0x1]  ;;  %v999_v28 = vld [vmem:[#allocation2 + $0x1d] sm:$0x1]  ;;  %v1005_v2 = vsel %vm909_vm4, %v1004_v18, %v996_v15  ;;  %v1042_v4 = vrot.slane %v1035_v20, 7 }
 0x373   : > { %1029 = vrot.lane.b32.xlu0 %v1028_v13, %s1269_s16  ;;  %972 = vrot.lane.b32.xlu1 %v971_v14, %s1270_s17  ;;  %v911_v29 = vrot.slane %v902_v27, 6  ;;  %v914_v30 = vrot.slane %v903_v24, 5  ;;  %v1007_v31 = vsel %vm912_vm5, %v1006_v19, %v1005_v2  ;;  %v1034_v32 = vld [vmem:[#allocation2 + $0x7] sm:$0x1]  ;;  %v1044_v33 = vrot.slane %v1036_v25, 6 }
 0x374   : > { %v910_v7 = vsel %vm909_vm4, %v908_v26, %v900_v22  ;;  %v1008_v35 = vrot.slane %v999_v28, 5  ;;  %v1037_v37 = vld [vmem:[#allocation2 + $0x1f] sm:$0x1]  ;;  %v1043_v60 = vsel %vm909_vm4, %v1042_v4, %v1034_v32 }
 0x375   : > { %v913_v34 = vsel %vm912_vm5, %v911_v29, %v910_v7  ;;  %v1045_v39 = vsel %vm912_vm5, %v1044_v33, %v1043_v60  ;;  %v1046_v40 = vrot.slane %v1037_v37, 5 }
 0x376   : > { %v916_v36 = vsel %vm915_vm6, %v914_v30, %v913_v34  ;;  %v1009_v38 = vsel %vm915_vm6, %v1008_v35, %v1007_v31 }
 0x377   : > { %991 = vrot.lane.b32.xlu1 %v990_v3, %s1271_s20  ;;  %919 = vst.msk [vmem:[%s1489_s19] sm:$0xf] %vm918_vm7, %v916_v36  ;;  %v1047_v41 = vsel %vm915_vm6, %v1046_v40, %v1045_v39 }
 0x37b   : > { %1010 = vrot.lane.b32.xlu1 %v1009_v38, %s1272_s23 }
 0x37f   : > { %1048 = vrot.lane.b32.xlu1 %v1047_v41, %s1273_s24 }
 0x3e1   : > { %v954_v61 = vpop.permute.xlu0 %953  ;;  %v935_v42 = vpop.permute.xlu1 %934 }
 0x3e2   : > { %938 = vst.msk [vmem:[%s1489_s19] sm:$0xf] %vm937_vm8, %v935_v42 }
 0x3e3   : > { %957 = vst.msk [vmem:[%s1489_s19] sm:$0xf] %vm956_vm9, %v954_v61 }
 0x3e5   : > { %v973_v43 = vpop.permute.xlu1 %972  ;;  %v1030_v46 = vpop.permute.xlu0 %1029 }
 0x3e6   : > { %976 = vst.msk [vmem:[%s1489_s19] sm:$0xf] %vm975_vm10, %v973_v43 }
 0x3e9   : > { %v992_v44 = vpop.permute.xlu1 %991 }
 0x3ea   : > { %995 = vst.msk [vmem:[%s1489_s19] sm:$0xf] %vm994_vm11, %v992_v44 }
 0x3ed   : > { %v1011_v45 = vpop.permute.xlu1 %1010 }
 0x3ee   : > { %1014 = vst.msk [vmem:[%s1489_s19] sm:$0xf] %vm1013_vm12, %v1011_v45 }
 0x3ef   : > { %1033 = vst.msk [vmem:[%s1489_s19] sm:$0xf] %vm1032_vm13, %v1030_v46 }
 0x3f1   : > { %v1049_v47 = vpop.permute.xlu1 %1048 }
 0x3f2   : > { %1052 = vst.msk [vmem:[%s1489_s19] sm:$0xf] %vm1051_vm14, %v1049_v47 }
 0x3f3 PF: > { %s16_s21 = sadd.s32 1, %s1265_s21  }
 0x3f4   : > { %p13_p4 = scmp.ge.s32.totalorder %s16_s21, 4  }
 0x3f6   :  { %15 = sbr.rel (!%p13_p4) target bundleno = 1 (0x1), region = 79 }

</bundles_post_ra>
